<compile_context>
chip_gen: v6e
topology: v6e:2x2x1
jax: 0.10.0
libtpu: 0.0.40
codegen_flags: <defaults>
</compile_context>

<pallas_src>
import jax
import jax.numpy as jnp
from jax.experimental import pallas as pl
from jax.experimental.pallas import tpu as pltpu

EMBED_DIM = 128
NUM_HEADS = 8
HEAD_DIM = EMBED_DIM // NUM_HEADS

PALLAS_MIN_M = 128   # below this many rows, plain XLA dot+bias beats a pallas_call
MAX_TILE_M = 2048    # rows per grid step at large M (multiple of 8, fits VMEM everywhere)


# ---------------------------------------------------------------------------
# Pallas kernel: fused (q|k) projection.
#   acc = X @ [Wq^T | Wk^T]   (one 256-wide MXU pass)
#   q   = acc[:, :128] + bq   (lane-dense 128-wide store)
#   k   = acc[:, 128:] + bk   (lane-dense 128-wide store)
# ---------------------------------------------------------------------------
def _fused_qk_kernel(x_ref, wt_ref, bq_ref, bk_ref, q_ref, k_ref):
    acc = jnp.dot(x_ref[...], wt_ref[...], preferred_element_type=jnp.float32)
    q_ref[...] = (acc[:, :EMBED_DIM] + bq_ref[...]).astype(q_ref.dtype)
    k_ref[...] = (acc[:, EMBED_DIM:] + bk_ref[...]).astype(k_ref.dtype)


def _round_up(x, m):
    return ((x + m - 1) // m) * m


def _choose_tile_m(M):
    if M <= 8:
        return M  # full-M block (bypasses the sublane divisibility rule)
    # ~M/2 rounded to the f32 sublane multiple, capped at MAX_TILE_M -> grid >= 2 steps
    # for moderate M (keeps both v7x TensorCores busy), multiple steps for large M.
    tile = min(MAX_TILE_M, _round_up(pl.cdiv(M, 2), 8))
    return min(tile, M)


def fused_qk_projection(x2d, wt_qk, bq, bk):
    """x2d: (M, 128) f32; wt_qk: (128, 256) f32 (pre-transposed [Wq^T|Wk^T]);
    bq, bk: (1, 128) f32.  Returns (q2d, k2d), each (M, 128)."""
    M, K = x2d.shape
    tile_m = _choose_tile_m(M)
    grid = (pl.cdiv(M, tile_m),)
    q2d, k2d = pl.pallas_call(
        _fused_qk_kernel,
        out_shape=(
            jax.ShapeDtypeStruct((M, EMBED_DIM), x2d.dtype),
            jax.ShapeDtypeStruct((M, EMBED_DIM), x2d.dtype),
        ),
        grid_spec=pltpu.PrefetchScalarGridSpec(
            num_scalar_prefetch=0,
            grid=grid,
            in_specs=[
                pl.BlockSpec((tile_m, K), lambda i: (i, 0)),
                # Weight / bias blocks return (0, 0) for every i -> stay VMEM-resident.
                pl.BlockSpec((K, 2 * EMBED_DIM), lambda i: (0, 0)),
                pl.BlockSpec((1, EMBED_DIM), lambda i: (0, 0)),
                pl.BlockSpec((1, EMBED_DIM), lambda i: (0, 0)),
            ],
            out_specs=[
                pl.BlockSpec((tile_m, EMBED_DIM), lambda i: (i, 0)),
                pl.BlockSpec((tile_m, EMBED_DIM), lambda i: (i, 0)),
            ],
        ),
        compiler_params=pltpu.CompilerParams(
            dimension_semantics=("parallel",)),
    )(x2d, wt_qk, bq, bk)
    return q2d, k2d


# ---------------------------------------------------------------------------
# Glue (plain JAX, runs inside the same jit as the kernel)
# ---------------------------------------------------------------------------
def _split_heads(y2d, B, S):
    # torch.stack(y.chunk(H, dim=-1)) -> (H, B, S, head_dim)
    return jnp.transpose(y2d.reshape(B, S, NUM_HEADS, HEAD_DIM), (2, 0, 1, 3))


def init_params(key):
    kq_w, kq_b, kk_w, kk_b, kv_w, kv_b, kd_w, kd_b = jax.random.split(key, 8)
    bound = 1.0 / jnp.sqrt(EMBED_DIM)

    def lin(kw, kb):
        w = jax.random.uniform(kw, (EMBED_DIM, EMBED_DIM), jnp.float32, -bound, bound)
        b = jax.random.uniform(kb, (EMBED_DIM,), jnp.float32, -bound, bound)
        return w, b

    return {
        "wq": lin(kq_w, kq_b),
        "wk": lin(kk_w, kk_b),
        "wv": lin(kv_w, kv_b),     # defined in the module but unused in forward
        "dense": lin(kd_w, kd_b),  # defined in the module but unused in forward
    }


def prepare_fused_params(params):
    """One-time (outside the hot path): pre-transpose wq/wk and concat along N."""
    wq_w, wq_b = params["wq"]
    wk_w, wk_b = params["wk"]
    wt_qk = jnp.concatenate([wq_w.T, wk_w.T], axis=1)   # (128, 256)
    return {
        "wt_qk": wt_qk,
        "bq": wq_b.reshape(1, EMBED_DIM),
        "bk": wk_b.reshape(1, EMBED_DIM),
    }


@jax.jit
def model_forward(fused, x1, x2=None, x3=None):
    B, S, E = x1.shape
    M = B * S
    x2d = x1.reshape(M, E)

    if M >= PALLAS_MIN_M:
        yq, yk = fused_qk_projection(x2d, fused["wt_qk"], fused["bq"], fused["bk"])
    else:
        # Tiny-M fallback: pallas_call launch/DMA setup would dominate; let XLA fuse.
        y = x2d @ fused["wt_qk"]
        yq = y[:, :EMBED_DIM] + fused["bq"]
        yk = y[:, EMBED_DIM:] + fused["bk"]

    vq = _split_heads(yq, B, S)   # reference: v = wq(x) and q = wq(x) -> same tensor
    k = _split_heads(yk, B, S)

    # tril(ones) OR triu(ones, 1) over the same (S,S) is all-True; computed faithfully,
    # it constant-folds under jit.
    causal_mask = jnp.triu(jnp.ones((S, S), jnp.float32), 1).astype(jnp.bool_)
    attn_mask = jnp.tril(jnp.ones((S, S), jnp.float32)).astype(jnp.bool_)
    attn_mask = attn_mask | causal_mask

    return vq, k, vq, attn_mask


if __name__ == "__main__":
    key = jax.random.PRNGKey(0)
    pkey, xkey = jax.random.split(key)
    params = init_params(pkey)
    fused = prepare_fused_params(params)

    # M = B*S = 256 rows >= PALLAS_MIN_M -> Pallas path, 2 grid steps (both v7x TCs).
    B, S = 2, 128
    x1 = jax.random.normal(xkey, (B, S, EMBED_DIM), jnp.float32)
    x2 = jnp.zeros((1,), jnp.float32)   # unused by forward, present for signature parity
    x3 = jnp.zeros((1,), jnp.float32)

    v, k, q, attn_mask = jax.block_until_ready(model_forward(fused, x1, x2, x3))

    assert v.shape == (NUM_HEADS, B, S, HEAD_DIM)
    assert k.shape == (NUM_HEADS, B, S, HEAD_DIM)
    assert q.shape == (NUM_HEADS, B, S, HEAD_DIM)
    assert attn_mask.shape == (S, S) and attn_mask.dtype == jnp.bool_
    assert bool(jnp.all(attn_mask))

    # sanity check vs plain-JAX reference
    x2d = x1.reshape(B * S, EMBED_DIM)
    ref_q = x2d @ params["wq"][0].T + params["wq"][1]
    ref_k = x2d @ params["wk"][0].T + params["wk"][1]
    ref_q4 = jnp.transpose(ref_q.reshape(B, S, NUM_HEADS, HEAD_DIM), (2, 0, 1, 3))
    ref_k4 = jnp.transpose(ref_k.reshape(B, S, NUM_HEADS, HEAD_DIM), (2, 0, 1, 3))
    assert jnp.allclose(q, ref_q4, atol=1e-5, rtol=1e-5)
    assert jnp.allclose(v, ref_q4, atol=1e-5, rtol=1e-5)   # v == wq(x) per reference
    assert jnp.allclose(k, ref_k4, atol=1e-5, rtol=1e-5)

    print("KERNEL_OK")
</pallas_src>

<mosaic_0001>
module attributes {stable_mosaic.version = 11 : i64} {
  func.func @_fused_qk_kernel(%arg0: i32, %arg1: memref<128x128xf32, #tpu.memory_space<vmem>>, %arg2: memref<128x256xf32, #tpu.memory_space<vmem>>, %arg3: memref<1x128xf32, #tpu.memory_space<vmem>>, %arg4: memref<1x128xf32, #tpu.memory_space<vmem>>, %arg5: memref<128x128xf32, #tpu.memory_space<vmem>>, %arg6: memref<128x128xf32, #tpu.memory_space<vmem>>) attributes {dimension_semantics = [#tpu.dimension_semantics<parallel>], iteration_bounds = array<i64: 2>, scalar_prefetch = 0 : i64, scratch_operands = 0 : i64, tpu.core_type = #tpu.core_type<tc>, window_params = [{transform_indices = @transform_0, window_bounds = array<i64: 128, 128>}, {pipeline_mode = #tpu.pipeline_mode<synchronous>, transform_indices = @transform_1, window_bounds = array<i64: 128, 256>}, {pipeline_mode = #tpu.pipeline_mode<synchronous>, transform_indices = @transform_2, window_bounds = array<i64: 1, 128>}, {pipeline_mode = #tpu.pipeline_mode<synchronous>, transform_indices = @transform_3, window_bounds = array<i64: 1, 128>}, {transform_indices = @transform_4, window_bounds = array<i64: 128, 128>}, {transform_indices = @transform_5, window_bounds = array<i64: 128, 128>}]} {
    %c0 = arith.constant 0 : index
    %c0_0 = arith.constant 0 : index
    %0 = vector.load %arg1[%c0, %c0_0] : memref<128x128xf32, #tpu.memory_space<vmem>>, vector<128x128xf32>
    %c0_1 = arith.constant 0 : index
    %c0_2 = arith.constant 0 : index
    %1 = vector.load %arg2[%c0_1, %c0_2] : memref<128x256xf32, #tpu.memory_space<vmem>>, vector<128x256xf32>
    %cst = arith.constant dense<0.000000e+00> : vector<128x256xf32>
    %2 = tpu.matmul %0, %1, %cst {dimension_numbers = #tpu.dot_dimension_numbers<[1], [0], [0], [1], [0, 0, 1, 1], [], []>} : vector<128x128xf32>, vector<128x256xf32>, vector<128x256xf32> -> vector<128x256xf32>
    %3 = vector.extract_strided_slice %2 {offsets = [0, 0], sizes = [128, 128], strides = [1, 1]} : vector<128x256xf32> to vector<128x128xf32>
    %c0_3 = arith.constant 0 : index
    %c0_4 = arith.constant 0 : index
    %4 = vector.load %arg3[%c0_3, %c0_4] : memref<1x128xf32, #tpu.memory_space<vmem>>, vector<1x128xf32>
    %5 = vector.broadcast %4 : vector<1x128xf32> to vector<128x128xf32>
    %6 = arith.addf %3, %5 : vector<128x128xf32>
    %c0_5 = arith.constant 0 : index
    %c0_6 = arith.constant 0 : index
    %7 = vector.load %arg5[%c0_5, %c0_6] : memref<128x128xf32, #tpu.memory_space<vmem>>, vector<128x128xf32>
    tpu.vector_store %arg5[%c0_5, %c0_6], %6 {strides = array<i32>} : memref<128x128xf32, #tpu.memory_space<vmem>>, vector<128x128xf32>,
    %8 = vector.extract_strided_slice %2 {offsets = [0, 128], sizes = [128, 128], strides = [1, 1]} : vector<128x256xf32> to vector<128x128xf32>
    %c0_7 = arith.constant 0 : index
    %c0_8 = arith.constant 0 : index
    %9 = vector.load %arg4[%c0_7, %c0_8] : memref<1x128xf32, #tpu.memory_space<vmem>>, vector<1x128xf32>
    %10 = vector.broadcast %9 : vector<1x128xf32> to vector<128x128xf32>
    %11 = arith.addf %8, %10 : vector<128x128xf32>
    %c0_9 = arith.constant 0 : index
    %c0_10 = arith.constant 0 : index
    %12 = vector.load %arg6[%c0_9, %c0_10] : memref<128x128xf32, #tpu.memory_space<vmem>>, vector<128x128xf32>
    tpu.vector_store %arg6[%c0_9, %c0_10], %11 {strides = array<i32>} : memref<128x128xf32, #tpu.memory_space<vmem>>, vector<128x128xf32>,
    return
  }
  func.func @transform_0(%arg0: i32) -> (i32, i32) {
    %c0_i32 = arith.constant 0 : i32
    %c0_i32_0 = arith.constant 0 : i32
    return %arg0, %c0_i32 : i32, i32
  }
  func.func @transform_1(%arg0: i32) -> (i32, i32) {
    %c0_i32 = arith.constant 0 : i32
    %c0_i32_0 = arith.constant 0 : i32
    %c0_i32_1 = arith.constant 0 : i32
    return %c0_i32, %c0_i32_0 : i32, i32
  }
  func.func @transform_2(%arg0: i32) -> (i32, i32) {
    %c0_i32 = arith.constant 0 : i32
    %c0_i32_0 = arith.constant 0 : i32
    %c0_i32_1 = arith.constant 0 : i32
    return %c0_i32, %c0_i32_0 : i32, i32
  }
  func.func @transform_3(%arg0: i32) -> (i32, i32) {
    %c0_i32 = arith.constant 0 : i32
    %c0_i32_0 = arith.constant 0 : i32
    %c0_i32_1 = arith.constant 0 : i32
    return %c0_i32, %c0_i32_0 : i32, i32
  }
  func.func @transform_4(%arg0: i32) -> (i32, i32) {
    %c0_i32 = arith.constant 0 : i32
    %c0_i32_0 = arith.constant 0 : i32
    return %arg0, %c0_i32 : i32, i32
  }
  func.func @transform_5(%arg0: i32) -> (i32, i32) {
    %c0_i32 = arith.constant 0 : i32
    %c0_i32_0 = arith.constant 0 : i32
    return %arg0, %c0_i32 : i32, i32
  }
}

</mosaic_0001>

<bundles_post_ra>
// kernel: model_forward.1
= control target key start
LH: loop header
LB: loop body
LE: loop exit
PB: predicated region body
PF: predicated region fallthrough
CT: control target
= control target key end

     0   :  { %11 = vsyncpa [#allocation3], 0  ;;  %s1224_s0 = inlined_call_operand.hbm [shape: f32[256,128], index: 0, kind: input, shape index: {}]   ;;  %s1225_s1 = inlined_call_operand.hbm [shape: f32[128,256], index: 1, kind: input, shape index: {}]   ;;  %s1226_s2 = inlined_call_operand.vmem [shape: f32[1,128], index: 2, kind: input, shape index: {}]   ;;  %s1227_s3 = inlined_call_operand.hbm [shape: f32[1,128], index: 3, kind: input, shape index: {}]   ;;  %s1228_s4 = inlined_call_operand.vmem [shape: f32[256,128], index: 4, kind: output, shape index: {0}]   ;;  %s1229_s5 = inlined_call_operand.vmem [shape: f32[256,128], index: 5, kind: output, shape index: {1}]  }
   0x1   :  { %13 = vsyncpa [#allocation3 + $0x1], 0 }
   0x2   :  { %14 = vsyncpa [#allocation5], 0  ;;  %s972_s18 = smov 0   ;;  %s974_s19 = smov 0  }
   0x3   :  { %s976_s20 = smov 0   ;;  %s978_s21 = smov 0  }
   0x4 LB: > { %s695_s22 = sadd.s32 4294967295, %s932_s21   ;;  %p40_p0 = scmp.ne.s32.totalorder %s924_s19, %s920_s18  ;;  %s932_s21 = sphi %s978_s21, %s1245_s21   ;;  %s928_s20 = sphi %s976_s20, %s1244_s20   ;;  %s924_s19 = sphi %s974_s19, %s1243_s19   ;;  %s920_s18 = sphi %s972_s18, %s1242_s18  }
   0x5   : > { %p994_p1 = scmp.eq.s32.totalorder %s695_s22, 0  ;;  %p697_p2 = scmp.ge.s32.totalorder %s932_s21, 1 }
   0x6   : > { %p166_p3 = scmp.lt.s32.totalorder %s932_s21, 3  ;;  %s934_s26 = smov [#allocation4]  }
   0x7   : > { %s1234_s23 = scalar_select %p994_p1, 1, 0 }
   0x8   : > { %p1002_p4 = por %p994_p1, %p40_p0  ;;  %p1006_p5 = pnand %p697_p2, %p166_p3 }
   0x9   : > { %s178_s27 = sshll.u32 %s934_s26, 4  ;;  %s935_s29 = smov [#allocation6]   ;;  %s179_s27 = int_to_ptr.vmem [resolvable:$true] %s178_s27 }
   0xa   : > { %s1235_s24 = scalar_select %p1002_p4, 1, 0 }
   0xb   : > { %s1236_s25 = scalar_select %p1006_p5, 1, 0 }
   0xc   : > { %p759_p6 = pneg %p1006_p5  ;;  %s195_s30 = sshll.u32 %s935_s29, 4  ;;  %s196_s30 = int_to_ptr.vmem [resolvable:$true] %s195_s30 }
   0xd   : > { %s825_s6 = scalar_lea.vmem %s179_s27, 4096  ;;  %p833_p12 = scmp.lt.s32.totalorder %s179_s27, %s179_s27 }
   0xe   : > { %p1014_p7 = pnand %p759_p6, %p994_p1  ;;  %p826_p9 = scmp.ne.s32.totalorder %s179_s27, %s825_s6 }
   0xf   : > { %p834_p13 = scmp.lt.s32.totalorder %s825_s6, %s825_s6 }
  0x10   : > { %p816_p8 = pneg %p1014_p7 }
  0x11   : > { %p835_p0 = por %p834_p13, %p833_p12 }
  0x12   : > { %p828_p10 = pnand %p826_p9, %p816_p8 }
  0x14   : > { %p829_p11 = pneg %p828_p10 }
  0x16   : > { %p836_p2 = pnand %p835_p0, %p829_p11 }
  0x18   : > { %839 = shalt.err (!%p836_p2)
}
  0x19   : > { %s936_s7 = smov 256   ;;  %s937_s8 = smov 16  }
  0x1a   : > { %762 = dma.hbm_to_vmem [thread:$0]  (!%p1014_p7), %s1225_s1, 4096, %s179_s27, [#allocation5], %s936_s7, %s936_s7, %s937_s8  }
  0x1b   : > { %s851_s11 = scalar_lea.vmem %s196_s30, 16  ;;  %s858_s12 = scalar_lea.vmem %s196_s30, 32 }
  0x1c   : > { %p852_p3 = scmp.ne.s32.totalorder %s196_s30, %s851_s11  ;;  %p859_p10 = scmp.lt.s32.totalorder %s196_s30, %s196_s30 }
  0x1d   : > { %p860_p12 = scmp.lt.s32.totalorder %s858_s12, %s851_s11 }
  0x1e   : > { %p854_p6 = pnand %p852_p3, %p816_p8 }
  0x1f   : > { %p861_p11 = por %p860_p12, %p859_p10 }
  0x20   : > { %p855_p9 = pneg %p854_p6 }
  0x22   : > { %p862_p13 = pnand %p861_p11, %p855_p9 }
  0x24   : > { %865 = shalt.err (!%p862_p13)
}
  0x25   : > { %765 = dma.hbm_to_vmem [thread:$0]  (!%p1014_p7), %s1227_s3, 16, %s196_s30, [#allocation5]  }
  0x26   : > { %s1037_s15 = sadd.s32 1, %s932_s21   ;;  %s27_s16 = sadd.s32 1, %s928_s20 }
  0x27   : > { %s24_s17 = ssub.s32 %s932_s21, %s1037_s15  ;;  %p34_p8 = scmp.ne.s32.totalorder %s928_s20, %s924_s19 }
  0x28   : > { %p25_p0 = scmp.eq.s32.totalorder %s24_s17, 0  ;;  %p35_p2 = scmp.eq.s32.totalorder %s932_s21, 0 }
  0x29   : > { %p772_p3 = scmp.lt.s32.totalorder %s932_s21, 2  ;;  %s206_s18 = sand.u32 1, %s928_s20  }
  0x2a   : > { %s1048_s26 = scalar_select %p25_p0, %s928_s20, %s27_s16  }
  0x2b   : > { %p36_p6 = por %p35_p2, %p34_p8  ;;  %s701_s27 = sshll.u32 %s206_s18, 7 }
  0x2c   : > { %s716_s28 = sshll.u32 %s932_s21, 11  ;;  %s210_s30 = scalar_lea.vmem [#allocation2], %s701_s27 }
  0x2d   : > { %s1054_s7 = scalar_lea.hbm %s1224_s0, %s716_s28  ;;  %s217_s8 = sshll.u32 %s210_s30, 4  ;;  %s1060_s8 = int_to_ptr.vmem [resolvable:$true] %s217_s8 }
  0x2e   : > { %p1056_p7 = pnand %p772_p3, %p36_p6  ;;  %s1062_s10 = scalar_lea.sflag [#allocation3], %s206_s18 }
  0x2f   : > { %s866_s11 = scalar_lea.hbm %s1054_s7, 2048  ;;  %s871_s14 = scalar_lea.hbm %s1224_s0, 4096 }
  0x30   : > { %p867_p9 = scmp.ne.s32.totalorder %s1054_s7, %s866_s11  ;;  %p868_p10 = pneg %p1056_p7 }
  0x31   : > { %p872_p13 = scmp.lt.s32.totalorder %s1054_s7, %s1224_s0  ;;  %p873_p8 = scmp.lt.s32.totalorder %s871_s14, %s866_s11 }
  0x32   : > { %p869_p12 = pnand %p868_p10, %p867_p9 }
  0x33   : > { %p874_p0 = por %p873_p8, %p872_p13 }
  0x34   : > { %p870_p11 = pneg %p869_p12 }
  0x36   : > { %p875_p2 = pnand %p874_p0, %p870_p11 }
  0x38   : > { %878 = shalt.err (!%p875_p2)
}
  0x39   : > { %s879_s18 = scalar_lea.vmem %s1060_s8, 2048  ;;  %s938_s27 = smov [#allocation2]  }
  0x3a   : > { %p880_p3 = scmp.ne.s32.totalorder %s1060_s8, %s879_s18  ;;  %s884_s28 = sshll.u32 %s938_s27, 4  ;;  %s885_s28 = int_to_ptr.vmem [resolvable:$false] %s884_s28 }
  0x3b   : > { %s886_s29 = scalar_lea.vmem %s885_s28, 4096  ;;  %p887_p12 = scmp.lt.s32.totalorder %s1060_s8, %s885_s28 }
  0x3c   : > { %p882_p6 = pnand %p880_p3, %p868_p10  ;;  %p888_p1 = scmp.lt.s32.totalorder %s886_s29, %s879_s18 }
  0x3e   : > { %p883_p9 = pneg %p882_p6  ;;  %p889_p4 = por %p888_p1, %p887_p12 }
  0x40   : > { %p890_p5 = pnand %p889_p4, %p883_p9 }
  0x42   : > { %893 = shalt.err (!%p890_p5)
}
  0x43   : > { %s939_s6 = smov 128   ;;  %s940_s30 = smov 8  }
  0x44   : > { %769 = dma.hbm_to_vmem [thread:$0]  (!%p1056_p7), %s1054_s7, 2048, %s1060_s8, %s1062_s10, %s939_s6, %s939_s6, %s940_s30  }
  0x45   : > { %p1239_p10 = scmp.ne.s32.totalorder %s1236_s25, 0 }
  0x46   : > { %s231_s11 = sand.u32 (!%p1239_p10), 1, %s924_s19   ;;  %p1240_p1 = scmp.ne.s32.totalorder (!%p1239_p10), %s1235_s24, 0 }
  0x47   : > { %229 = sbr.rel (%p1239_p10) target bundleno = 340 (0x154), region = 36  ;;  %s705_s12 = sshll.u32 (!%p1239_p10), %s231_s11, 7 }
  0x48   : > { %s232_s13 = scalar_lea.sflag (!%p1239_p10), [#allocation3], %s231_s11  ;;  %s1086_s14 = scalar_lea.vmem (!%p1239_p10), [#allocation2], %s705_s12 }
  0x4c   : > { %911 = dma.done.wait (%p1240_p1), %s232_s13, 2048  }
  0x4d   : > { %913 = vsyncadd (%p1240_p1), %s232_s13, 4294965248  ;;  %p1241_p4 = scmp.ne.s32.totalorder %s1234_s23, 0 }
  0x4f   : > { %915 = dma.done.wait (%p1241_p4), [#allocation5], 4112  }
  0x50   : > { %917 = vsyncadd (%p1241_p4), [#allocation5], 4294963184  ;;  %v941_v0 = vmov 0.0   ;;  %v335_v1 = vld [vmem:[#allocation4 + $0xf8] sm:$0xff]  ;;  %v334_v2 = vld [vmem:[#allocation4 + $0xf0] sm:$0xff]  ;;  %s708_s23 = sshll.u32 %s695_s22, 4 }
  0x51   : > { %400 = vmatprep.mubr.f32.mxu0 %v941_v0  ;;  %448 = vmatprep.mubr.f32.mxu1 %v941_v0  ;;  %v333_v3 = vld [vmem:[#allocation4 + $0xe8] sm:$0xff]  ;;  %v332_v4 = vld [vmem:[#allocation4 + $0xe0] sm:$0xff]  ;;  %v331_v5 = vld [vmem:[#allocation4 + $0xd8] sm:$0xff]  ;;  %p277_p5 = scmp.lt.s32.totalorder %s708_s23, 31 }
  0x52   : > { %336 = vmatprep.subr.mxu0 %v335_v1  ;;  %717 = vmatprep.subr.mxu1 %v335_v1  ;;  %v330_v6 = vld [vmem:[#allocation4 + $0xd0] sm:$0xff]  ;;  %v329_v7 = vld [vmem:[#allocation4 + $0xc8] sm:$0xff]  ;;  %v328_v8 = vld [vmem:[#allocation4 + $0xc0] sm:$0xff] }
  0x53   : > { %337 = vmatpush1.msra.mxu0 %v334_v2  ;;  %733 = vmatpush1.msra.mxu1 %v334_v2  ;;  %v327_v9 = vld [vmem:[#allocation4 + $0xb8] sm:$0xff]  ;;  %v326_v10 = vld [vmem:[#allocation4 + $0xb0] sm:$0xff]  ;;  %v325_v11 = vld [vmem:[#allocation4 + $0xa8] sm:$0xff]  ;;  %s1247_s23 = smov (!%p277_p5, %s708_s23), 31 }
  0x54   : > { %338 = vmatprep.subr.mxu0 %v333_v3  ;;  %718 = vmatprep.subr.mxu1 %v333_v3  ;;  %v324_v12 = vld [vmem:[#allocation4 + $0xa0] sm:$0xff]  ;;  %v323_v13 = vld [vmem:[#allocation4 + $0x98] sm:$0xff]  ;;  %v322_v14 = vld [vmem:[#allocation4 + $0x90] sm:$0xff]  ;;  %s709_s24 = sshll.u32 %s1247_s23, 3 }
  0x55   : > { %339 = vmatpush1.msra.mxu0 %v332_v4  ;;  %734 = vmatpush1.msra.mxu1 %v332_v4  ;;  %v321_v15 = vld [vmem:[#allocation4 + $0x88] sm:$0xff]  ;;  %v320_v16 = vld [vmem:[#allocation4 + $0x80] sm:$0xff]  ;;  %v319_v17 = vld [vmem:[#allocation4 + $0x78] sm:$0xff]  ;;  %s1138_s10 = scalar_lea.vmem %s1228_s4, %s709_s24  ;;  %s1147_s16 = scalar_lea.vmem %s1229_s5, %s709_s24 }
  0x56   : > { %340 = vmatprep.subr.mxu0 %v331_v5  ;;  %719 = vmatprep.subr.mxu1 %v331_v5  ;;  %v318_v18 = vld [vmem:[#allocation4 + $0x70] sm:$0xff]  ;;  %v317_v19 = vld [vmem:[#allocation4 + $0x68] sm:$0xff]  ;;  %v316_v20 = vld [vmem:[#allocation4 + $0x60] sm:$0xff] }
  0x57   : > { %341 = vmatpush1.msra.mxu0 %v330_v6  ;;  %735 = vmatpush1.msra.mxu1 %v330_v6  ;;  %v315_v21 = vld [vmem:[#allocation4 + $0x58] sm:$0xff]  ;;  %v314_v22 = vld [vmem:[#allocation4 + $0x50] sm:$0xff]  ;;  %v313_v23 = vld [vmem:[#allocation4 + $0x48] sm:$0xff] }
  0x58   : > { %342 = vmatprep.subr.mxu0 %v329_v7  ;;  %720 = vmatprep.subr.mxu1 %v329_v7  ;;  %v312_v24 = vld [vmem:[#allocation4 + $0x40] sm:$0xff]  ;;  %v311_v25 = vld [vmem:[#allocation4 + $0x38] sm:$0xff]  ;;  %v310_v26 = vld [vmem:[#allocation4 + $0x30] sm:$0xff] }
  0x59   : > { %343 = vmatpush1.msra.mxu0 %v328_v8  ;;  %736 = vmatpush1.msra.mxu1 %v328_v8  ;;  %v309_v27 = vld [vmem:[#allocation4 + $0x28] sm:$0xff]  ;;  %v308_v28 = vld [vmem:[#allocation4 + $0x20] sm:$0xff]  ;;  %v307_v29 = vld [vmem:[#allocation4 + $0x18] sm:$0xff] }
  0x5a   : > { %344 = vmatprep.subr.mxu0 %v327_v9  ;;  %721 = vmatprep.subr.mxu1 %v327_v9  ;;  %v306_v30 = vld [vmem:[#allocation4 + $0x10] sm:$0xff]  ;;  %v305_v31 = vld [vmem:[#allocation4 + $0x8] sm:$0xff]  ;;  %v304_v32 = vld [vmem:[#allocation4] sm:$0xff] }
  0x5b   : > { %345 = vmatpush1.msra.mxu0 %v326_v10  ;;  %737 = vmatpush1.msra.mxu1 %v326_v10  ;;  %v288_v33 = vld [vmem:[%s1086_s14] sm:$0xff]  ;;  %v289_v35 = vld [vmem:[%s1086_s14 + $0x8] sm:$0xff]  ;;  %v290_v37 = vld [vmem:[%s1086_s14 + $0x10] sm:$0xff] }
  0x5c   : > { %346 = vmatprep.subr.mxu0 %v325_v11  ;;  %722 = vmatprep.subr.mxu1 %v325_v11  ;;  %v296_v34 = vld [vmem:[%s1086_s14 + $0x40] sm:$0xff]  ;;  %v297_v36 = vld [vmem:[%s1086_s14 + $0x48] sm:$0xff]  ;;  %v298_v38 = vld [vmem:[%s1086_s14 + $0x50] sm:$0xff] }
  0x5d   : > { %347 = vmatpush1.msra.mxu0 %v324_v12  ;;  %738 = vmatpush1.msra.mxu1 %v324_v12  ;;  %v291_v39 = vld [vmem:[%s1086_s14 + $0x18] sm:$0xff]  ;;  %v292_v41 = vld [vmem:[%s1086_s14 + $0x20] sm:$0xff]  ;;  %v293_v43 = vld [vmem:[%s1086_s14 + $0x28] sm:$0xff] }
  0x5e   : > { %348 = vmatprep.subr.mxu0 %v323_v13  ;;  %723 = vmatprep.subr.mxu1 %v323_v13  ;;  %v299_v40 = vld [vmem:[%s1086_s14 + $0x58] sm:$0xff]  ;;  %v300_v42 = vld [vmem:[%s1086_s14 + $0x60] sm:$0xff]  ;;  %v301_v44 = vld [vmem:[%s1086_s14 + $0x68] sm:$0xff] }
  0x5f   : > { %349 = vmatpush1.msra.mxu0 %v322_v14  ;;  %739 = vmatpush1.msra.mxu1 %v322_v14  ;;  %v294_v45 = vld [vmem:[%s1086_s14 + $0x30] sm:$0xff]  ;;  %v295_v47 = vld [vmem:[%s1086_s14 + $0x38] sm:$0xff]  ;;  %v1133_v49 = vld [vmem:[%s1226_s2] ss:$0 sm:$0xff] }
  0x60   : > { %350 = vmatprep.subr.mxu0 %v321_v15  ;;  %724 = vmatprep.subr.mxu1 %v321_v15  ;;  %v302_v46 = vld [vmem:[%s1086_s14 + $0x70] sm:$0xff]  ;;  %v303_v48 = vld [vmem:[%s1086_s14 + $0x78] sm:$0xff]  ;;  %v1140_v52 = vld [vmem:[#allocation6] ss:$0 sm:$0xff] }
  0x61   : > { %351 = vmatpush1.msra.mxu0 %v320_v16  ;;  %740 = vmatpush1.msra.mxu1 %v320_v16 }
  0x62   : > { %352 = vmatprep.subr.mxu0 %v319_v17  ;;  %725 = vmatprep.subr.mxu1 %v319_v17 }
  0x63   : > { %353 = vmatpush1.msra.mxu0 %v318_v18  ;;  %741 = vmatpush1.msra.mxu1 %v318_v18 }
  0x64   : > { %354 = vmatprep.subr.mxu0 %v317_v19  ;;  %726 = vmatprep.subr.mxu1 %v317_v19 }
  0x65   : > { %355 = vmatpush1.msra.mxu0 %v316_v20  ;;  %742 = vmatpush1.msra.mxu1 %v316_v20 }
  0x66   : > { %356 = vmatprep.subr.mxu0 %v315_v21  ;;  %727 = vmatprep.subr.mxu1 %v315_v21 }
  0x67   : > { %357 = vmatpush1.msra.mxu0 %v314_v22  ;;  %743 = vmatpush1.msra.mxu1 %v314_v22 }
  0x68   : > { %358 = vmatprep.subr.mxu0 %v313_v23  ;;  %728 = vmatprep.subr.mxu1 %v313_v23 }
  0x69   : > { %359 = vmatpush1.msra.mxu0 %v312_v24  ;;  %744 = vmatpush1.msra.mxu1 %v312_v24 }
  0x6a   : > { %360 = vmatprep.subr.mxu0 %v311_v25  ;;  %729 = vmatprep.subr.mxu1 %v311_v25 }
  0x6b   : > { %361 = vmatpush1.msra.mxu0 %v310_v26  ;;  %745 = vmatpush1.msra.mxu1 %v310_v26 }
  0x6c   : > { %362 = vmatprep.subr.mxu0 %v309_v27  ;;  %730 = vmatprep.subr.mxu1 %v309_v27 }
  0x6d   : > { %363 = vmatpush1.msra.mxu0 %v308_v28  ;;  %746 = vmatpush1.msra.mxu1 %v308_v28 }
  0x6e   : > { %364 = vmatprep.subr.mxu0 %v307_v29  ;;  %731 = vmatprep.subr.mxu1 %v307_v29 }
  0x6f   : > { %365 = vmatpush1.msra.mxu0 %v306_v30  ;;  %747 = vmatpush1.msra.mxu1 %v306_v30 }
  0x70   : > { %366 = vmatprep.subr.mxu0 %v305_v31  ;;  %732 = vmatprep.subr.mxu1 %v305_v31 }
  0x71   : > { %367 = vmatpush1.msra.mxu0 %v304_v32  ;;  %748 = vmatpush1.msra.mxu1 %v304_v32 }
  0x72   : > { %401 = vmatmul.mubr.f32.vlgmr.msra.gmra.mxu0 %v288_v33  ;;  %449 = vmatmul.mubr.f32.vlgmr.msra.gmra.mxu1 %v296_v34 }
  0x73   : > { %406 = vmatprep.mubr.f32.mxu0 %v941_v0  ;;  %454 = vmatprep.mubr.f32.mxu1 %v941_v0 }
  0x76   : > { %407 = vmatmul.mubr.f32.gmra.mxu0 %v289_v35  ;;  %455 = vmatmul.mubr.f32.gmra.mxu1 %v297_v36 }
  0x77   : > { %412 = vmatprep.mubr.f32.mxu0 %v941_v0  ;;  %460 = vmatprep.mubr.f32.mxu1 %v941_v0 }
  0x7a   : > { %413 = vmatmul.mubr.f32.gmra.mxu0 %v290_v37  ;;  %461 = vmatmul.mubr.f32.gmra.mxu1 %v298_v38 }
  0x7b   : > { %418 = vmatprep.mubr.f32.mxu0 %v941_v0  ;;  %466 = vmatprep.mubr.f32.mxu1 %v941_v0 }
  0x7e   : > { %419 = vmatmul.mubr.f32.gmra.mxu0 %v291_v39  ;;  %467 = vmatmul.mubr.f32.gmra.mxu1 %v299_v40 }
  0x7f   : > { %424 = vmatprep.mubr.f32.mxu0 %v941_v0  ;;  %472 = vmatprep.mubr.f32.mxu1 %v941_v0 }
  0x82   : > { %425 = vmatmul.mubr.f32.gmra.mxu0 %v292_v41  ;;  %473 = vmatmul.mubr.f32.gmra.mxu1 %v300_v42 }
  0x83   : > { %430 = vmatprep.mubr.f32.mxu0 %v941_v0  ;;  %478 = vmatprep.mubr.f32.mxu1 %v941_v0 }
  0x86   : > { %431 = vmatmul.mubr.f32.gmra.mxu0 %v293_v43  ;;  %479 = vmatmul.mubr.f32.gmra.mxu1 %v301_v44 }
  0x87   : > { %436 = vmatprep.mubr.f32.mxu0 %v941_v0  ;;  %484 = vmatprep.mubr.f32.mxu1 %v941_v0 }
  0x8a   : > { %437 = vmatmul.mubr.f32.gmra.mxu0 %v294_v45  ;;  %485 = vmatmul.mubr.f32.gmra.mxu1 %v302_v46 }
  0x8b   : > { %442 = vmatprep.mubr.f32.mxu0 %v941_v0  ;;  %490 = vmatprep.mubr.f32.mxu1 %v941_v0 }
  0x8e   : > { %443 = vmatmul.mubr.f32.gmra.mxu0 %v295_v47  ;;  %491 = vmatmul.mubr.f32.gmra.mxu1 %v303_v48 }
 0x132   : > { %v402_v50 = vpop.f32.mrf.mxu0  ;;  %v450_v51 = vpop.f32.mrf.mxu1 }
 0x133   : > { %v504_v53 = vadd.f32 %v1133_v49, %v402_v50  ;;  %v512_v54 = vadd.f32 %v1133_v49, %v450_v51 }
 0x134   : > { %v404_v55 = vpop.f32.mrf.mxu0  ;;  %v452_v56 = vpop.f32.mrf.mxu1 }
 0x135   : > { %520 = vst [vmem:[%s1138_s10] sm:$0xff] %v504_v53  ;;  %528 = vst [vmem:[%s1138_s10 + $0x40] sm:$0xff] %v512_v54  ;;  %v543_v57 = vadd.f32 %v1140_v52, %v404_v55  ;;  %v551_v58 = vadd.f32 %v1140_v52, %v452_v56 }
 0x136   : > { %v408_v59 = vpop.f32.mrf.mxu0  ;;  %v456_v60 = vpop.f32.mrf.mxu1 }
 0x137   : > { %559 = vst [vmem:[%s1147_s16] sm:$0xff] %v543_v57  ;;  %567 = vst [vmem:[%s1147_s16 + $0x40] sm:$0xff] %v551_v58  ;;  %v505_v61 = vadd.f32 %v1133_v49, %v408_v59  ;;  %v513_v62 = vadd.f32 %v1133_v49, %v456_v60 }
 0x138   : > { %v410_v63 = vpop.f32.mrf.mxu0  ;;  %v458_v0 = vpop.f32.mrf.mxu1 }
 0x139   : > { %521 = vst [vmem:[%s1138_s10 + $0x8] sm:$0xff] %v505_v61  ;;  %529 = vst [vmem:[%s1138_s10 + $0x48] sm:$0xff] %v513_v62  ;;  %v544_v1 = vadd.f32 %v1140_v52, %v410_v63  ;;  %v552_v2 = vadd.f32 %v1140_v52, %v458_v0 }
 0x13a   : > { %v414_v3 = vpop.f32.mrf.mxu0  ;;  %v462_v4 = vpop.f32.mrf.mxu1 }
 0x13b   : > { %560 = vst [vmem:[%s1147_s16 + $0x8] sm:$0xff] %v544_v1  ;;  %568 = vst [vmem:[%s1147_s16 + $0x48] sm:$0xff] %v552_v2  ;;  %v506_v5 = vadd.f32 %v1133_v49, %v414_v3  ;;  %v514_v6 = vadd.f32 %v1133_v49, %v462_v4 }
 0x13c   : > { %v416_v7 = vpop.f32.mrf.mxu0  ;;  %v464_v8 = vpop.f32.mrf.mxu1 }
 0x13d   : > { %522 = vst [vmem:[%s1138_s10 + $0x10] sm:$0xff] %v506_v5  ;;  %530 = vst [vmem:[%s1138_s10 + $0x50] sm:$0xff] %v514_v6  ;;  %v545_v9 = vadd.f32 %v1140_v52, %v416_v7  ;;  %v553_v10 = vadd.f32 %v1140_v52, %v464_v8 }
 0x13e   : > { %v420_v11 = vpop.f32.mrf.mxu0  ;;  %v468_v12 = vpop.f32.mrf.mxu1 }
 0x13f   : > { %561 = vst [vmem:[%s1147_s16 + $0x10] sm:$0xff] %v545_v9  ;;  %569 = vst [vmem:[%s1147_s16 + $0x50] sm:$0xff] %v553_v10  ;;  %v507_v13 = vadd.f32 %v1133_v49, %v420_v11  ;;  %v515_v14 = vadd.f32 %v1133_v49, %v468_v12 }
 0x140   : > { %v422_v15 = vpop.f32.mrf.mxu0  ;;  %v470_v16 = vpop.f32.mrf.mxu1 }
 0x141   : > { %523 = vst [vmem:[%s1138_s10 + $0x18] sm:$0xff] %v507_v13  ;;  %531 = vst [vmem:[%s1138_s10 + $0x58] sm:$0xff] %v515_v14  ;;  %v546_v17 = vadd.f32 %v1140_v52, %v422_v15  ;;  %v554_v18 = vadd.f32 %v1140_v52, %v470_v16 }
 0x142   : > { %v426_v19 = vpop.f32.mrf.mxu0  ;;  %v474_v20 = vpop.f32.mrf.mxu1 }
 0x143   : > { %562 = vst [vmem:[%s1147_s16 + $0x18] sm:$0xff] %v546_v17  ;;  %570 = vst [vmem:[%s1147_s16 + $0x58] sm:$0xff] %v554_v18  ;;  %v508_v21 = vadd.f32 %v1133_v49, %v426_v19  ;;  %v516_v22 = vadd.f32 %v1133_v49, %v474_v20 }
 0x144   : > { %v428_v23 = vpop.f32.mrf.mxu0  ;;  %v476_v24 = vpop.f32.mrf.mxu1 }
 0x145   : > { %524 = vst [vmem:[%s1138_s10 + $0x20] sm:$0xff] %v508_v21  ;;  %532 = vst [vmem:[%s1138_s10 + $0x60] sm:$0xff] %v516_v22  ;;  %v547_v25 = vadd.f32 %v1140_v52, %v428_v23  ;;  %v555_v26 = vadd.f32 %v1140_v52, %v476_v24 }
 0x146   : > { %v432_v27 = vpop.f32.mrf.mxu0  ;;  %v480_v28 = vpop.f32.mrf.mxu1 }
 0x147   : > { %563 = vst [vmem:[%s1147_s16 + $0x20] sm:$0xff] %v547_v25  ;;  %571 = vst [vmem:[%s1147_s16 + $0x60] sm:$0xff] %v555_v26  ;;  %v509_v29 = vadd.f32 %v1133_v49, %v432_v27  ;;  %v517_v30 = vadd.f32 %v1133_v49, %v480_v28 }
 0x148   : > { %v434_v31 = vpop.f32.mrf.mxu0  ;;  %v482_v32 = vpop.f32.mrf.mxu1 }
 0x149   : > { %525 = vst [vmem:[%s1138_s10 + $0x28] sm:$0xff] %v509_v29  ;;  %533 = vst [vmem:[%s1138_s10 + $0x68] sm:$0xff] %v517_v30  ;;  %v548_v33 = vadd.f32 %v1140_v52, %v434_v31  ;;  %v556_v34 = vadd.f32 %v1140_v52, %v482_v32 }
 0x14a   : > { %v438_v35 = vpop.f32.mrf.mxu0  ;;  %v486_v36 = vpop.f32.mrf.mxu1 }
 0x14b   : > { %564 = vst [vmem:[%s1147_s16 + $0x28] sm:$0xff] %v548_v33  ;;  %572 = vst [vmem:[%s1147_s16 + $0x68] sm:$0xff] %v556_v34  ;;  %v510_v37 = vadd.f32 %v1133_v49, %v438_v35  ;;  %v518_v38 = vadd.f32 %v1133_v49, %v486_v36 }
 0x14c   : > { %v440_v39 = vpop.f32.mrf.mxu0  ;;  %v488_v40 = vpop.f32.mrf.mxu1 }
 0x14d   : > { %526 = vst [vmem:[%s1138_s10 + $0x30] sm:$0xff] %v510_v37  ;;  %534 = vst [vmem:[%s1138_s10 + $0x70] sm:$0xff] %v518_v38  ;;  %v549_v41 = vadd.f32 %v1140_v52, %v440_v39  ;;  %v557_v42 = vadd.f32 %v1140_v52, %v488_v40 }
 0x14e   : > { %v444_v43 = vpop.f32.mrf.mxu0  ;;  %v492_v44 = vpop.f32.mrf.mxu1 }
 0x14f   : > { %565 = vst [vmem:[%s1147_s16 + $0x30] sm:$0xff] %v549_v41  ;;  %573 = vst [vmem:[%s1147_s16 + $0x70] sm:$0xff] %v557_v42  ;;  %v511_v45 = vadd.f32 %v1133_v49, %v444_v43  ;;  %v519_v46 = vadd.f32 %v1133_v49, %v492_v44 }
 0x150   : > { %v446_v47 = vpop.f32.mrf.mxu0  ;;  %v494_v48 = vpop.f32.mrf.mxu1 }
 0x151   : > { %527 = vst [vmem:[%s1138_s10 + $0x38] sm:$0xff] %v511_v45  ;;  %535 = vst [vmem:[%s1138_s10 + $0x78] sm:$0xff] %v519_v46  ;;  %v550_v50 = vadd.f32 %v1140_v52, %v446_v47  ;;  %v558_v51 = vadd.f32 %v1140_v52, %v494_v48 }
 0x153   : > { %566 = vst [vmem:[%s1147_s16 + $0x38] sm:$0xff] %v550_v50  ;;  %574 = vst [vmem:[%s1147_s16 + $0x78] sm:$0xff] %v558_v51 }
 0x154 PF: > { %p17_p7 = scmp.ge.s32.totalorder %s1037_s15, 4   ;;  %s1242_s18 = smov %s924_s19 }
 0x155   : > { %s1243_s19 = smov %s928_s20  ;;  %s1244_s20 = smov %s1048_s26 }
 0x156   : > { %s1245_s21 = smov %s1037_s15  ;;  %19 = sbr.rel (!%p17_p7) target bundleno = 4 (0x4), region = 96 }
 0x15b   :  { %614 = vsyncpa [#allocation3], 1 }
 0x15c   :  { %616 = vsyncpa [#allocation3 + $0x1], 1 }
 0x15d   :  { %617 = vsyncpa [#allocation5], 1 }

</bundles_post_ra>
